<compile_context>
chip_gen: v7x
topology: tpu7x:2x2x1
jax: 0.10.0
libtpu: 0.0.40
codegen_flags: <defaults>
</compile_context>

<pallas_src>
import jax
import jax.numpy as jnp
from jax import lax
from jax.experimental import pallas as pl
from jax.experimental.pallas import tpu as pltpu


def _make_kernel(N, TB, P, L, fold):
    """Kernel factory; N/TB/P/L/fold are static Python ints/bools."""
    need_mask = (N % TB) != 0

    def kernel(sa_ref, out_ref, acc_ref):
        # sa_ref : (TB, P, L) block in the input's native dtype.
        # out_ref: (1, 1) f32, written only in the epilogue.
        # acc_ref: (8 or TB, L) f32 lane-dense accumulator, resident across steps.
        step = pl.program_id(0)

        @pl.when(step == 0)
        def _():
            acc_ref[...] = jnp.zeros_like(acc_ref)

        sa = sa_ref[...].astype(jnp.float32)           # VPU upcast (no-op for f32)
        colsum = jnp.sum(sa, axis=1)                   # (TB, L): sum over parts
        sumsq = jnp.sum(sa * sa, axis=1)               # (TB, L)
        # Per (slab, l): 2 * sum_{j>i} SA_i[l]*SA_j[l] = colsum^2 - sum_p SA_p^2
        contrib = colsum * colsum - sumsq              # (TB, L)

        if need_mask:
            # Ragged tail: ignore rows past the real slab count N.
            row = step * TB + lax.broadcasted_iota(jnp.int32, (TB, 1), 0)
            contrib = jnp.where(row < N, contrib, 0.0)

        if fold:
            # Fold over TB with plain vreg adds -> tiny (8, L) accumulator RMW.
            contrib = jnp.sum(contrib.reshape(TB // 8, 8, L), axis=0)
        acc_ref[...] += contrib

        @pl.when(step == pl.num_programs(0) - 1)
        def _():
            # Single epilogue cross-lane/sublane reduce + sub-(8,128) store.
            out_ref[...] = jnp.zeros_like(out_ref) + 0.5 * jnp.sum(acc_ref[...])

    return kernel


def part_overlap_loss(A, *, target_block_bytes=4 * 1024 * 1024):
    """A: float array of shape (B, T, P, *spatial). Returns scalar f32 loss."""
    A = jnp.asarray(A)                      # keep native dtype (no f32 HBM pass)
    B, T, P = A.shape[:3]
    L = 1
    for d in A.shape[3:]:
        L *= d
    N = B * T
    SA = A.reshape(N, P, L)

    # TB slabs per grid step.  Budget in f32-equivalent bytes so any in-kernel
    # f32 temporaries stay bounded independent of the input dtype.
    slab_f32_bytes = max(P * L * 4, 1)
    TB = max(8, (target_block_bytes // slab_f32_bytes) // 8 * 8)
    TB = min(TB, N)                         # never larger than the slab stream
    if TB >= 8:
        TB = (TB // 8) * 8                  # multiple of 8 -> enables the fold
    fold = (TB % 8 == 0)
    acc_rows = 8 if fold else TB
    steps = pl.cdiv(N, TB)                  # ragged tail masked in-kernel

    itemsize = jnp.dtype(A.dtype).itemsize
    out = pl.pallas_call(
        _make_kernel(N, TB, P, L, fold),
        out_shape=jax.ShapeDtypeStruct((1, 1), jnp.float32),
        grid_spec=pltpu.PrefetchScalarGridSpec(
            num_scalar_prefetch=0,
            grid=(steps,),
            in_specs=[pl.BlockSpec((TB, P, L), lambda i: (i, 0, 0))],
            out_specs=pl.BlockSpec((1, 1), lambda i: (0, 0)),
            scratch_shapes=[pltpu.VMEM((acc_rows, L), jnp.float32)],
        ),
        compiler_params=pltpu.CompilerParams(
            dimension_semantics=("arbitrary",),   # accumulator carried across steps
            vmem_limit_bytes=32 * 1024 * 1024,    # safe on v5e/v6e/v7x
        ),
        cost_estimate=pl.CostEstimate(
            flops=int(3 * N * P * L),
            transcendentals=0,
            bytes_accessed=int(N * P * L * itemsize + 4),
        ),
    )(SA)

    total = out[0, 0]
    # Matches torch semantics: P == 1 gives 0 / 0 == NaN.
    denom = float(B * T * max((P - 1) * (P - 1), 0))
    return total / denom


def _reference(A):
    """Pure-JAX transcription of the PyTorch module (no MXU, f32 throughout)."""
    A = jnp.asarray(A, jnp.float32)
    B, T, P = A.shape[:3]
    SA = A.reshape(B, T, P, -1)
    n = max((P - 1) * (P - 1), 0)
    gram = (SA[..., :, None, :] * SA[..., None, :, :]).sum(-1)     # (B,T,P,P)
    row = lax.broadcasted_iota(jnp.int32, (P, P), 0)
    col = lax.broadcasted_iota(jnp.int32, (P, P), 1)
    tri = jnp.where(col > row, gram, 0.0).sum((-1, -2))
    return tri.mean() / n


if __name__ == "__main__":
    key = jax.random.PRNGKey(0)
    k1, k2, k3 = jax.random.split(key, 3)

    # Test 1: f32, (B*T) divides the block size exactly.
    A1 = jax.random.normal(k1, (2, 4, 8, 16, 16), dtype=jnp.float32)
    got1 = jax.block_until_ready(part_overlap_loss(A1))
    ref1 = _reference(A1)
    assert jnp.allclose(got1, ref1, rtol=1e-4, atol=1e-4), (got1, ref1)

    # Test 2: f32, ragged slab count (B*T = 15) -> exercises the in-kernel mask.
    A2 = jax.random.normal(k2, (3, 5, 8, 16, 16), dtype=jnp.float32)
    got2 = jax.block_until_ready(part_overlap_loss(A2))
    ref2 = _reference(A2)
    assert jnp.allclose(got2, ref2, rtol=1e-4, atol=1e-4), (got2, ref2)

    # Test 3: bf16 input -> exercises native-dtype DMA + in-kernel f32 upcast.
    A3 = jax.random.normal(k3, (2, 4, 8, 16, 16), dtype=jnp.bfloat16)
    got3 = jax.block_until_ready(part_overlap_loss(A3))
    ref3 = _reference(A3)
    assert jnp.allclose(got3, ref3, rtol=1e-3, atol=1e-3), (got3, ref3)

    print("KERNEL_OK")
</pallas_src>

<mosaic_0001>
module attributes {stable_mosaic.version = 11 : i64} {
  func.func @kernel(%arg0: i32, %arg1: memref<8x8x256xf32, #tpu.memory_space<vmem>>, %arg2: memref<1x1xf32, #tpu.memory_space<vmem>>, %arg3: memref<8x256xf32, #tpu.memory_space<vmem>>) attributes {dimension_semantics = [#tpu.dimension_semantics<arbitrary>], iteration_bounds = array<i64: 1>, scalar_prefetch = 0 : i64, scratch_operands = 1 : i64, tpu.core_type = #tpu.core_type<tc>, window_params = [{transform_indices = @transform_0, window_bounds = array<i64: 8, 8, 256>}, {pipeline_mode = #tpu.pipeline_mode<synchronous>, transform_indices = @transform_1, window_bounds = array<i64: 1, 1>}]} {
    %c0_i32 = arith.constant 0 : i32
    %0 = arith.cmpi eq, %arg0, %c0_i32 : i32
    %1 = arith.extui %0 : i1 to i32
    %c0_i32_0 = arith.constant 0 : i32
    %2 = arith.cmpi ne, %1, %c0_i32_0 : i32
    scf.if %2 {
      %cst_11 = arith.constant 0.000000e+00 : f32
      %17 = vector.broadcast %cst_11 : f32 to vector<8x256xf32>
      %c0_12 = arith.constant 0 : index
      %c0_13 = arith.constant 0 : index
      %18 = vector.load %arg3[%c0_12, %c0_13] : memref<8x256xf32, #tpu.memory_space<vmem>>, vector<8x256xf32>
      tpu.vector_store %arg3[%c0_12, %c0_13], %17 {strides = array<i32>} : memref<8x256xf32, #tpu.memory_space<vmem>>, vector<8x256xf32>,
    } else {
    }
    %c0 = arith.constant 0 : index
    %c0_1 = arith.constant 0 : index
    %c0_2 = arith.constant 0 : index
    %3 = vector.load %arg1[%c0, %c0_1, %c0_2] : memref<8x8x256xf32, #tpu.memory_space<vmem>>, vector<8x8x256xf32>
    %cst = arith.constant dense<0.000000e+00> : vector<8x256xf32>
    %4 = vector.multi_reduction <add>, %3, %cst [1] : vector<8x8x256xf32> to vector<8x256xf32>
    %5 = arith.mulf %3, %3 : vector<8x8x256xf32>
    %cst_3 = arith.constant dense<0.000000e+00> : vector<8x256xf32>
    %6 = vector.multi_reduction <add>, %5, %cst_3 [1] : vector<8x8x256xf32> to vector<8x256xf32>
    %7 = arith.mulf %4, %4 : vector<8x256xf32>
    %8 = arith.subf %7, %6 : vector<8x256xf32>
    %9 = vector.shape_cast %8 : vector<8x256xf32> to vector<1x8x256xf32>
    %cst_4 = arith.constant dense<0.000000e+00> : vector<8x256xf32>
    %10 = vector.multi_reduction <add>, %9, %cst_4 [0] : vector<1x8x256xf32> to vector<8x256xf32>
    %c0_5 = arith.constant 0 : index
    %c0_6 = arith.constant 0 : index
    %11 = vector.load %arg3[%c0_5, %c0_6] : memref<8x256xf32, #tpu.memory_space<vmem>>, vector<8x256xf32>
    %12 = arith.addf %11, %10 : vector<8x256xf32>
    %c0_7 = arith.constant 0 : index
    %c0_8 = arith.constant 0 : index
    %13 = vector.load %arg3[%c0_7, %c0_8] : memref<8x256xf32, #tpu.memory_space<vmem>>, vector<8x256xf32>
    tpu.vector_store %arg3[%c0_7, %c0_8], %12 {strides = array<i32>} : memref<8x256xf32, #tpu.memory_space<vmem>>, vector<8x256xf32>,
    %c0_i32_9 = arith.constant 0 : i32
    %14 = arith.cmpi eq, %arg0, %c0_i32_9 : i32
    %15 = arith.extui %14 : i1 to i32
    %c0_i32_10 = arith.constant 0 : i32
    %16 = arith.cmpi ne, %15, %c0_i32_10 : i32
    scf.if %16 {
      %cst_11 = arith.constant 0.000000e+00 : f32
      %17 = vector.broadcast %cst_11 : f32 to vector<1x1xf32>
      %c0_12 = arith.constant 0 : index
      %c0_13 = arith.constant 0 : index
      %18 = vector.load %arg3[%c0_12, %c0_13] : memref<8x256xf32, #tpu.memory_space<vmem>>, vector<8x256xf32>
      %19 = vector.shape_cast %18 : vector<8x256xf32> to vector<1x8x256xf32>
      %cst_14 = arith.constant dense<0.000000e+00> : vector<1xf32>
      %20 = vector.multi_reduction <add>, %19, %cst_14 [1, 2] : vector<1x8x256xf32> to vector<1xf32>
      %21 = vector.shape_cast %20 : vector<1xf32> to vector<1x1x1xf32>
      %22 = vector.extract %21[0, 0, 0] : f32 from vector<1x1x1xf32>
      %cst_15 = arith.constant 5.000000e-01 : f32
      %23 = arith.mulf %cst_15, %22 : f32
      %24 = vector.broadcast %23 : f32 to vector<1x1xf32>
      %25 = arith.addf %17, %24 : vector<1x1xf32>
      %c0_16 = arith.constant 0 : index
      %c0_17 = arith.constant 0 : index
      %26 = vector.load %arg2[%c0_16, %c0_17] : memref<1x1xf32, #tpu.memory_space<vmem>>, vector<1x1xf32>
      tpu.vector_store %arg2[%c0_16, %c0_17], %25 {strides = array<i32>} : memref<1x1xf32, #tpu.memory_space<vmem>>, vector<1x1xf32>,
    } else {
    }
    return
  }
  func.func @transform_0(%arg0: i32) -> (i32, i32, i32) {
    %c0_i32 = arith.constant 0 : i32
    %c0_i32_0 = arith.constant 0 : i32
    %c0_i32_1 = arith.constant 0 : i32
    return %arg0, %c0_i32, %c0_i32_0 : i32, i32, i32
  }
  func.func @transform_1(%arg0: i32) -> (i32, i32) {
    %c0_i32 = arith.constant 0 : i32
    %c0_i32_0 = arith.constant 0 : i32
    %c0_i32_1 = arith.constant 0 : i32
    return %c0_i32, %c0_i32_0 : i32, i32
  }
}

</mosaic_0001>

<bundles_post_ra>
// kernel: tpu_custom_call.1
= control target key start
LH: loop header
LB: loop body
LE: loop exit
PB: predicated region body
PF: predicated region fallthrough
CT: control target
= control target key end

     0   :  { %6 = vsyncpa [#allocation4], 0  ;;  %s653_s0 = inlined_call_operand.hbm [shape: f32[8,8,256], index: 0, kind: input, shape index: {}]   ;;  %s654_s1 = inlined_call_operand.hbm [shape: f32[1,1], index: 1, kind: output, shape index: {}]  }
   0x1   :  { %7 = vsyncpa [#allocation5], 0  ;;  %s435_s6 = smov [#allocation3]   ;;  %s387_s10 = scalar_lea.hbm %s653_s0, 2048 }
   0x2   :  { %s13_s7 = sshll.u32 %s435_s6, 4  ;;  %p388_p0 = scmp.ne.s32.totalorder %s653_s0, %s387_s10  ;;  %s14_s7 = int_to_ptr.vmem [resolvable:$true] %s13_s7 }
   0x3   :  { %p391_p1 = scmp.lt.u32.totalorder %s387_s10, %s653_s0 }
   0x5   :  { %p393_p2 = pnand %p391_p1, %p388_p0 }
   0x7   :  { %396 = shalt.err (!%p393_p2)
}
   0x8   :  { %s397_s15 = scalar_lea.vmem %s14_s7, 2048  ;;  %p402_p4 = scmp.lt.s32.totalorder %s14_s7, %s14_s7 }
   0x9   :  { %p398_p3 = scmp.ne.s32.totalorder %s14_s7, %s397_s15  ;;  %p403_p5 = scmp.lt.s32.totalorder %s397_s15, %s397_s15 }
   0xb   :  { %p404_p6 = por %p403_p5, %p402_p4 }
   0xd   :  { %p405_p7 = pnand %p404_p6, %p398_p3 }
   0xf   :  { %408 = shalt.err (!%p405_p7)
}
  0x10   :  { %s436_s16 = smov 256   ;;  %s437_s17 = smov 16  }
  0x11   :  { %19 = dma.hbm_to_vmem [thread:$0]  %s653_s0, 2048, %s14_s7, [#allocation4], %s436_s16, %s436_s16, %s437_s17  }
  0x12   :  { %431 = dma.done.wait [#allocation4], 2048  }
  0x13   :  { %432 = vsyncadd [#allocation4], 4294965248  ;;  %v29_v0 = vld [vmem:[#allocation3] sm:$0xff]  ;;  %v30_v1 = vld [vmem:[#allocation3 + $0x8] sm:$0xff]  ;;  %vm319_vm0 = vcmask 1041409   ;;  %vm321_vm1 = vcmask 1042434  }
  0x14   :  { %v461_v2 = vld [vmem:[#allocation3 + $0x10] sm:$0xff]  ;;  %v463_v3 = vld [vmem:[#allocation3 + $0x18] sm:$0xff]  ;;  %v465_v4 = vld [vmem:[#allocation3 + $0x20] sm:$0xff]  ;;  %v45_v6 = vrot.slane %v29_v0, 4  ;;  %v51_v7 = vrot.slane %v30_v1, 4  ;;  %v497_v52 = vmul.f32 %v29_v0, %v29_v0  ;;  %v499_v53 = vmul.f32 %v30_v1, %v30_v1  ;;  %s438_s0 = smov [#allocation6]  }
  0x15   :  { %v467_v5 = vld [vmem:[#allocation3 + $0x28] sm:$0xff]  ;;  %v57_v8 = vrot.slane %v461_v2, 4  ;;  %v470_v9 = vld [vmem:[#allocation3 + $0x30] sm:$0xff]  ;;  %v472_v10 = vld [vmem:[#allocation3 + $0x38] sm:$0xff]  ;;  %v63_v11 = vrot.slane %v463_v3, 4  ;;  %v69_v12 = vrot.slane %v465_v4, 4 }
  0x16   :  { %v75_v13 = vrot.slane %v467_v5, 4  ;;  %v46_v14 = vadd.f32 %v45_v6, %v29_v0  ;;  %v52_v15 = vadd.f32 %v51_v7, %v30_v1  ;;  %v81_v17 = vrot.slane %v470_v9, 4  ;;  %v485_v42 = vld [vmem:[#allocation3 + $0x40] sm:$0xff]  ;;  %v487_v43 = vld [vmem:[#allocation3 + $0x48] sm:$0xff]  ;;  %v489_v44 = vld [vmem:[#allocation3 + $0x50] sm:$0xff]  ;;  %s372_s20 = sshll.u32 %s438_s0, 4  ;;  %s373_s20 = int_to_ptr.vmem [resolvable:$true] %s372_s20 }
  0x17   :  { %v58_v16 = vadd.f32 %v57_v8, %v461_v2  ;;  %v64_v18 = vadd.f32 %v63_v11, %v463_v3  ;;  %v70_v19 = vadd.f32 %v69_v12, %v465_v4  ;;  %v87_v21 = vrot.slane %v472_v10, 4  ;;  %v491_v47 = vld [vmem:[#allocation3 + $0x58] sm:$0xff]  ;;  %v493_v48 = vld [vmem:[#allocation3 + $0x60] sm:$0xff]  ;;  %v495_v49 = vld [vmem:[#allocation3 + $0x68] sm:$0xff]  ;;  %s409_s23 = scalar_lea.vmem %s373_s20, 16  ;;  %s413_s24 = scalar_lea.vmem %s373_s20, 32 }
  0x18   :  { %v76_v20 = vadd.f32 %v75_v13, %v467_v5  ;;  %v47_v22 = vrot.slane %v46_v14, 2  ;;  %v53_v23 = vrot.slane %v52_v15, 2  ;;  %v82_v25 = vadd.f32 %v81_v17, %v470_v9  ;;  %v501_v54 = vld [vmem:[#allocation3 + $0x70] sm:$0xff]  ;;  %v509_v59 = vld [vmem:[#allocation3 + $0x78] sm:$0xff]  ;;  %p410_p8 = scmp.ne.s32.totalorder %s373_s20, %s409_s23  ;;  %p414_p9 = scmp.lt.s32.totalorder %s373_s20, %s373_s20 }
  0x19   :  { %v59_v24 = vrot.slane %v58_v16, 2  ;;  %v65_v26 = vrot.slane %v64_v18, 2  ;;  %v71_v27 = vrot.slane %v70_v19, 2  ;;  %v88_v29 = vadd.f32 %v87_v21, %v472_v10  ;;  %p415_p10 = scmp.lt.s32.totalorder %s413_s24, %s409_s23 }
  0x1a   :  { %v77_v28 = vrot.slane %v76_v20, 2  ;;  %v48_v30 = vadd.f32 %v47_v22, %v46_v14  ;;  %v54_v31 = vadd.f32 %v53_v23, %v52_v15  ;;  %v83_v33 = vrot.slane %v82_v25, 2 }
  0x1b   :  { %v60_v32 = vadd.f32 %v59_v24, %v58_v16  ;;  %v66_v34 = vadd.f32 %v65_v26, %v64_v18  ;;  %v72_v35 = vadd.f32 %v71_v27, %v70_v19  ;;  %v89_v37 = vrot.slane %v88_v29, 2  ;;  %p416_p11 = por %p415_p10, %p414_p9 }
  0x1c   :  { %v78_v36 = vadd.f32 %v77_v28, %v76_v20  ;;  %v49_v38 = vrot.slane %v48_v30, 1  ;;  %v55_v39 = vrot.slane %v54_v31, 1  ;;  %v84_v41 = vadd.f32 %v83_v33, %v82_v25 }
  0x1d   :  { %v61_v40 = vrot.slane %v60_v32, 1  ;;  %v67_v45 = vrot.slane %v66_v34, 1  ;;  %v90_v46 = vadd.f32 %v89_v37, %v88_v29  ;;  %v73_v50 = vrot.slane %v72_v35, 1  ;;  %p417_p12 = pnand %p416_p11, %p410_p8 }
  0x1e   :  { %v79_v51 = vrot.slane %v78_v36, 1  ;;  %v503_v55 = vadd.f32 %v49_v38, %v48_v30  ;;  %v505_v56 = vadd.f32 %v55_v39, %v54_v31  ;;  %v85_v58 = vrot.slane %v84_v41, 1 }
  0x1f   :  { %v507_v57 = vadd.f32 %v61_v40, %v60_v32  ;;  %v511_v60 = vadd.f32 %v67_v45, %v66_v34  ;;  %v93_v61 = vrot.slane %v485_v42, 4  ;;  %v99_v62 = vrot.slane %v487_v43, 4 }
  0x20   :  { %v105_v63 = vrot.slane %v489_v44, 4  ;;  %v91_v0 = vrot.slane %v90_v46, 1  ;;  %v111_v1 = vrot.slane %v491_v47, 4  ;;  %v117_v6 = vrot.slane %v493_v48, 4 }
  0x21   :  { %v123_v7 = vrot.slane %v495_v49, 4  ;;  %v94_v8 = vadd.f32 %v93_v61, %v485_v42  ;;  %v100_v11 = vadd.f32 %v99_v62, %v487_v43  ;;  %v129_v13 = vrot.slane %v501_v54, 4 }
  0x22   :  { %v106_v12 = vadd.f32 %v105_v63, %v489_v44  ;;  %v112_v14 = vadd.f32 %v111_v1, %v491_v47  ;;  %v118_v15 = vadd.f32 %v117_v6, %v493_v48  ;;  %v135_v17 = vrot.slane %v509_v59, 4 }
  0x23   :  { %v124_v16 = vadd.f32 %v123_v7, %v495_v49  ;;  %v95_v18 = vrot.slane %v94_v8, 2  ;;  %v101_v19 = vrot.slane %v100_v11, 2  ;;  %v130_v21 = vadd.f32 %v129_v13, %v501_v54 }
  0x24   :  { %v107_v20 = vrot.slane %v106_v12, 2  ;;  %v113_v22 = vrot.slane %v112_v14, 2  ;;  %v119_v23 = vrot.slane %v118_v15, 2  ;;  %v136_v25 = vadd.f32 %v135_v17, %v509_v59 }
  0x25   :  { %v125_v24 = vrot.slane %v124_v16, 2  ;;  %v96_v26 = vadd.f32 %v95_v18, %v94_v8  ;;  %v102_v27 = vadd.f32 %v101_v19, %v100_v11  ;;  %v131_v29 = vrot.slane %v130_v21, 2 }
  0x26   :  { %v108_v28 = vadd.f32 %v107_v20, %v106_v12  ;;  %v114_v30 = vadd.f32 %v113_v22, %v112_v14  ;;  %v120_v31 = vadd.f32 %v119_v23, %v118_v15  ;;  %v137_v33 = vrot.slane %v136_v25, 2 }
  0x27   :  { %v126_v32 = vadd.f32 %v125_v24, %v124_v16  ;;  %v97_v34 = vrot.slane %v96_v26, 1  ;;  %v103_v37 = vrot.slane %v102_v27, 1  ;;  %v132_v39 = vadd.f32 %v131_v29, %v130_v21 }
  0x28   :  { %v109_v38 = vrot.slane %v108_v28, 1  ;;  %v529_v40 = vadd.f32 %v73_v50, %v72_v35  ;;  %v531_v45 = vadd.f32 %v79_v51, %v78_v36  ;;  %v115_v61 = vrot.slane %v114_v30, 1 }
  0x29   :  { %v138_v62 = vadd.f32 %v137_v33, %v136_v25  ;;  %v533_v63 = vadd.f32 %v85_v58, %v84_v41  ;;  %v121_v1 = vrot.slane %v120_v31, 1  ;;  %v127_v6 = vrot.slane %v126_v32, 1 }
  0x2a   :  { %v133_v7 = vrot.slane %v132_v39, 1  ;;  %v535_v8 = vadd.f32 %v91_v0, %v90_v46  ;;  %v537_v11 = vadd.f32 %v97_v34, %v96_v26  ;;  %v539_v12 = vadd.f32 %v103_v37, %v102_v27 }
  0x2b   :  { %v139_v13 = vrot.slane %v138_v62, 1  ;;  %v541_v14 = vadd.f32 %v109_v38, %v108_v28  ;;  %v543_v35 = vadd.f32 %v115_v61, %v114_v30  ;;  %v143_v36 = vmul.f32 %v461_v2, %v461_v2 }
  0x2c   :  { %v144_v41 = vmul.f32 %v463_v3, %v463_v3  ;;  %v145_v50 = vmul.f32 %v465_v4, %v465_v4  ;;  %v146_v46 = vmul.f32 %v467_v5, %v467_v5  ;;  %v147_v51 = vmul.f32 %v470_v9, %v470_v9 }
  0x2d   :  { %v148_v58 = vmul.f32 %v472_v10, %v472_v10  ;;  %v557_v0 = vadd.f32 %v121_v1, %v120_v31  ;;  %v559_v15 = vadd.f32 %v127_v6, %v126_v32  ;;  %v561_v2 = vadd.f32 %v133_v7, %v132_v39 }
  0x2e   :  { %v563_v16 = vadd.f32 %v139_v13, %v138_v62  ;;  %v149_v3 = vmul.f32 %v485_v42, %v485_v42  ;;  %v150_v4 = vmul.f32 %v487_v43, %v487_v43  ;;  %v151_v5 = vmul.f32 %v489_v44, %v489_v44 }
  0x2f   :  { %v152_v9 = vmul.f32 %v491_v47, %v491_v47  ;;  %v157_v10 = vrot.slane %v497_v52, 4  ;;  %v163_v17 = vrot.slane %v499_v53, 4  ;;  %v169_v18 = vrot.slane %v143_v36, 4 }
  0x30   :  { %v175_v19 = vrot.slane %v144_v41, 4  ;;  %v181_v20 = vrot.slane %v145_v50, 4  ;;  %v187_v21 = vrot.slane %v146_v46, 4  ;;  %v193_v22 = vrot.slane %v147_v51, 4 }
  0x31   :  { %v199_v23 = vrot.slane %v148_v58, 4  ;;  %v158_v42 = vadd.f32 %v157_v10, %v497_v52  ;;  %v164_v43 = vadd.f32 %v163_v17, %v499_v53  ;;  %v170_v24 = vadd.f32 %v169_v18, %v143_v36 }
  0x32   :  { %v176_v25 = vadd.f32 %v175_v19, %v144_v41  ;;  %v182_v44 = vadd.f32 %v181_v20, %v145_v50  ;;  %v188_v26 = vadd.f32 %v187_v21, %v146_v46  ;;  %v194_v27 = vadd.f32 %v193_v22, %v147_v51 }
  0x33   :  { %v200_v47 = vadd.f32 %v199_v23, %v148_v58  ;;  %v159_v28 = vrot.slane %v158_v42, 2  ;;  %v165_v29 = vrot.slane %v164_v43, 2  ;;  %v171_v30 = vrot.slane %v170_v24, 2 }
  0x34   :  { %v177_v31 = vrot.slane %v176_v25, 2  ;;  %v183_v32 = vrot.slane %v182_v44, 2  ;;  %v189_v33 = vrot.slane %v188_v26, 2  ;;  %v195_v34 = vrot.slane %v194_v27, 2 }
  0x35   :  { %v201_v37 = vrot.slane %v200_v47, 2  ;;  %v160_v38 = vadd.f32 %v159_v28, %v158_v42  ;;  %v166_v39 = vadd.f32 %v165_v29, %v164_v43  ;;  %v172_v61 = vadd.f32 %v171_v30, %v170_v24 }
  0x36   :  { %v178_v52 = vadd.f32 %v177_v31, %v176_v25  ;;  %v184_v62 = vadd.f32 %v183_v32, %v182_v44  ;;  %v190_v53 = vadd.f32 %v189_v33, %v188_v26  ;;  %v196_v1 = vadd.f32 %v195_v34, %v194_v27 }
  0x37   :  { %v202_v6 = vadd.f32 %v201_v37, %v200_v47  ;;  %v161_v7 = vrot.slane %v160_v38, 1  ;;  %v167_v13 = vrot.slane %v166_v39, 1  ;;  %v173_v36 = vrot.slane %v172_v61, 1 }
  0x38   :  { %v179_v41 = vrot.slane %v178_v52, 1  ;;  %v153_v50 = vmul.f32 %v493_v48, %v493_v48  ;;  %v154_v46 = vmul.f32 %v495_v49, %v495_v49  ;;  %v155_v51 = vmul.f32 %v501_v54, %v501_v54 }
  0x39   :  { %v156_v58 = vmul.f32 %v509_v59, %v509_v59  ;;  %v185_v10 = vrot.slane %v184_v62, 1  ;;  %v191_v17 = vrot.slane %v190_v53, 1  ;;  %v197_v18 = vrot.slane %v196_v1, 1 }
  0x3a   :  { %v203_v19 = vrot.slane %v202_v6, 1  ;;  %v585_v20 = vadd.f32 %v161_v7, %v160_v38  ;;  %v587_v21 = vadd.f32 %v167_v13, %v166_v39  ;;  %v589_v22 = vadd.f32 %v173_v36, %v172_v61 }
  0x3b   :  { %v591_v48 = vadd.f32 %v179_v41, %v178_v52  ;;  %v205_v23 = vrot.slane %v149_v3, 4  ;;  %v211_v49 = vrot.slane %v150_v4, 4  ;;  %v217_v42 = vrot.slane %v151_v5, 4 }
  0x3c   :  { %v223_v43 = vrot.slane %v152_v9, 4  ;;  %v229_v54 = vrot.slane %v153_v50, 4  ;;  %v235_v24 = vrot.slane %v154_v46, 4  ;;  %v241_v25 = vrot.slane %v155_v51, 4 }
  0x3d   :  { %v247_v59 = vrot.slane %v156_v58, 4  ;;  %v206_v44 = vadd.f32 %v205_v23, %v149_v3  ;;  %v212_v26 = vadd.f32 %v211_v49, %v150_v4  ;;  %v218_v27 = vadd.f32 %v217_v42, %v151_v5 }
  0x3e   :  { %v224_v47 = vadd.f32 %v223_v43, %v152_v9  ;;  %v230_v28 = vadd.f32 %v229_v54, %v153_v50  ;;  %v236_v29 = vadd.f32 %v235_v24, %v154_v46  ;;  %v242_v30 = vadd.f32 %v241_v25, %v155_v51 }
  0x3f   :  { %v248_v31 = vadd.f32 %v247_v59, %v156_v58  ;;  %v207_v32 = vrot.slane %v206_v44, 2  ;;  %v213_v33 = vrot.slane %v212_v26, 2  ;;  %v219_v34 = vrot.slane %v218_v27, 2 }
  0x40   :  { %v225_v37 = vrot.slane %v224_v47, 2  ;;  %v231_v38 = vrot.slane %v230_v28, 2  ;;  %v237_v39 = vrot.slane %v236_v29, 2  ;;  %v243_v61 = vrot.slane %v242_v30, 2 }
  0x41   :  { %v249_v52 = vrot.slane %v248_v31, 2  ;;  %v208_v7 = vadd.f32 %v207_v32, %v206_v44  ;;  %v214_v13 = vadd.f32 %v213_v33, %v212_v26  ;;  %v220_v36 = vadd.f32 %v219_v34, %v218_v27 }
  0x42   :  { %v226_v41 = vadd.f32 %v225_v37, %v224_v47  ;;  %v232_v3 = vadd.f32 %v231_v38, %v230_v28  ;;  %v238_v4 = vadd.f32 %v237_v39, %v236_v29  ;;  %v244_v5 = vadd.f32 %v243_v61, %v242_v30 }
  0x43   :  { %v250_v9 = vadd.f32 %v249_v52, %v248_v31  ;;  %v209_v50 = vrot.slane %v208_v7, 1  ;;  %v215_v46 = vrot.slane %v214_v13, 1  ;;  %v221_v51 = vrot.slane %v220_v36, 1 }
  0x44   :  { %v227_v58 = vrot.slane %v226_v41, 1  ;;  %v186_v23 = vadd.f32 %v185_v10, %v184_v62  ;;  %v192_v49 = vadd.f32 %v191_v17, %v190_v53  ;;  %v233_v42 = vrot.slane %v232_v3, 1 }
  0x45   :  { %v239_v43 = vrot.slane %v238_v4, 1  ;;  %v198_v54 = vadd.f32 %v197_v18, %v196_v1  ;;  %v204_v24 = vadd.f32 %v203_v19, %v202_v6  ;;  %v245_v25 = vrot.slane %v244_v5, 1 }
  0x46   :  { %v251_v59 = vrot.slane %v250_v9, 1  ;;  %v210_v44 = vadd.f32 %v209_v50, %v208_v7  ;;  %v216_v26 = vadd.f32 %v215_v46, %v214_v13  ;;  %v222_v27 = vadd.f32 %v221_v51, %v220_v36 }
  0x47   :  { %v228_v47 = vadd.f32 %v227_v58, %v226_v41  ;;  %vm323_vm2 = vcmask 1043459   ;;  %v253_v28 = vmul.f32 %v503_v55, %v503_v55  ;;  %v254_v62 = vmul.f32 %v505_v56, %v505_v56 }
  0x48   :  { %v255_v53 = vmul.f32 %v507_v57, %v507_v57  ;;  %v256_v1 = vmul.f32 %v511_v60, %v511_v60  ;;  %vm325_vm3 = vcmask 1044484   ;;  %v234_v6 = vadd.f32 %v233_v42, %v232_v3 }
  0x49   :  { %v240_v10 = vadd.f32 %v239_v43, %v238_v4  ;;  %v257_v17 = vmul.f32 %v529_v40, %v529_v40  ;;  %v258_v18 = vmul.f32 %v531_v45, %v531_v45  ;;  %v246_v19 = vadd.f32 %v245_v25, %v244_v5 }
  0x4a   :  { %v252_v55 = vadd.f32 %v251_v59, %v250_v9  ;;  %v259_v56 = vmul.f32 %v533_v63, %v533_v63  ;;  %v260_v57 = vmul.f32 %v535_v8, %v535_v8  ;;  %v261_v60 = vmul.f32 %v537_v11, %v537_v11 }
  0x4b   :  { %v262_v29 = vmul.f32 %v539_v12, %v539_v12  ;;  %v263_v40 = vmul.f32 %v541_v14, %v541_v14  ;;  %v264_v45 = vmul.f32 %v543_v35, %v543_v35  ;;  %v269_v30 = vsub.f32 %v253_v28, %v585_v20 }
  0x4c   :  { %v270_v31 = vsub.f32 %v254_v62, %v587_v21  ;;  %v271_v63 = vsub.f32 %v255_v53, %v589_v22  ;;  %v272_v8 = vsub.f32 %v256_v1, %v591_v48  ;;  %v265_v11 = vmul.f32 %v557_v0, %v557_v0 }
  0x4d   :  { %v266_v12 = vmul.f32 %v559_v15, %v559_v15  ;;  %v273_v32 = vsub.f32 %v257_v17, %v186_v23  ;;  %v274_v33 = vsub.f32 %v258_v18, %v192_v49  ;;  %v267_v14 = vmul.f32 %v561_v2, %v561_v2 }
  0x4e   :  { %v268_v35 = vmul.f32 %v563_v16, %v563_v16  ;;  %v275_v20 = vsub.f32 %v259_v56, %v198_v54  ;;  %v276_v21 = vsub.f32 %v260_v57, %v204_v24  ;;  %v277_v34 = vsub.f32 %v261_v60, %v210_v44 }
  0x4f   :  { %v278_v22 = vsub.f32 %v262_v29, %v216_v26  ;;  %vm327_vm4 = vcmask 1045509   ;;  %vm329_vm5 = vcmask 1046534   ;;  %v279_v48 = vsub.f32 %v263_v40, %v222_v27 }
  0x50   :  { %v280_v37 = vsub.f32 %v264_v45, %v228_v47  ;;  %v320_v0 = vsel %vm319_vm0, %v271_v63, %v269_v30  ;;  %v333_v15 = vsel %vm319_vm0, %v272_v8, %v270_v31  ;;  %v281_v38 = vsub.f32 %v265_v11, %v234_v6 }
  0x51   :  { %v282_v39 = vsub.f32 %v266_v12, %v240_v10  ;;  %v322_v61 = vsel %vm321_vm1, %v273_v32, %v320_v0  ;;  %v334_v2 = vsel %vm321_vm1, %v274_v33, %v333_v15  ;;  %v283_v52 = vsub.f32 %v267_v14, %v246_v19 }
  0x52   :  { %v284_v16 = vsub.f32 %v268_v35, %v252_v55  ;;  %v324_v7 = vsel %vm323_vm2, %v275_v20, %v322_v61  ;;  %v335_v13 = vsel %vm323_vm2, %v276_v21, %v334_v2  ;;  %vm331_vm6 = vcmask 1047559  }
  0x53   :  { %v326_v36 = vsel %vm325_vm3, %v277_v34, %v324_v7  ;;  %v336_v41 = vsel %vm325_vm3, %v278_v22, %v335_v13  ;;  %vm364_vm7 = vcmask 0  }
  0x54   :  { %v328_v3 = vsel %vm327_vm4, %v279_v48, %v326_v36  ;;  %v337_v4 = vsel %vm327_vm4, %v280_v37, %v336_v41 }
  0x55   :  { %v330_v5 = vsel %vm329_vm5, %v281_v38, %v328_v3  ;;  %v338_v9 = vsel %vm329_vm5, %v282_v39, %v337_v4 }
  0x56   :  { %v332_v50 = vsel %vm331_vm6, %v283_v52, %v330_v5  ;;  %v339_v46 = vsel %vm331_vm6, %v284_v16, %v338_v9 }
  0x57   :  { %v351_v51 = vadd.f32 %v339_v46, %v332_v50 }
  0x59   :  { %352 = vadd.xlane.f32.xlu0 %v351_v51 }
  0xe6   :  { %v353_v58 = vpop.xlane.xlu0 %352 }
  0xe7   :  { %v354_v23 = vrot.slane %v353_v58, 4 }
  0xe9   :  { %v355_v49 = vadd.f32 %v354_v23, %v353_v58 }
  0xeb   :  { %v356_v42 = vrot.slane %v355_v49, 2 }
  0xed   :  { %v357_v43 = vadd.f32 %v356_v42, %v355_v49 }
  0xef   :  { %v358_v54 = vrot.slane %v357_v43, 1 }
  0xf1   :  { %v359_v24 = vadd.f32 %v358_v54, %v357_v43 }
  0xf3   :  { %381 = vpush %v359_v24 }
 0x124   :  { %s382_s21 = spop %381 }
 0x125   :  { %s361_s22 = smul.f32 0.5, %s382_s21 }
 0x127   :  { %v362_v25 = vstv %s361_s22 }
 0x128   :  { %365 = vst.msk [vmem:[#allocation6] sm:$0x1] %vm364_vm7, %v362_v25 }
 0x129   :  { %420 = shalt.err (!%p417_p12)
}
 0x12a   :  { %s421_s27 = scalar_lea.hbm %s654_s1, 16 }
 0x12b   :  { %p422_p13 = scmp.ne.s32.totalorder %s654_s1, %s421_s27  ;;  %p425_p0 = scmp.lt.u32.totalorder %s421_s27, %s654_s1 }
 0x12d   :  { %p427_p1 = pnand %p425_p0, %p422_p13 }
 0x12f   :  { %430 = shalt.err (!%p427_p1)
}
 0x130   :  { %375 = dma.vmem_to_hbm [thread:$0]  %s373_s20, 16, %s654_s1, [#allocation5]  }
 0x131   :  { %433 = dma.done.wait [#allocation5], 16  }
 0x132   :  { %434 = vsyncadd [#allocation5], 4294967280 }
 0x133   :  { %379 = vsyncpa [#allocation4], 1 }
 0x134   :  { %380 = vsyncpa [#allocation5], 1 }

</bundles_post_ra>
